<compile_context>
chip_gen: v7x
topology: tpu7x:2x2x1
jax: 0.10.0
libtpu: 0.0.40
codegen_flags: <defaults>
</compile_context>

<pallas_src>
import jax
import jax.numpy as jnp
import numpy as np
from jax.experimental import pallas as pl
from jax.experimental.pallas import tpu as pltpu


def _round_up(v, m):
    return ((v + m - 1) // m) * m


def _pick_group_size(B, T, target_rows=256):
    """Largest divisor G of B with G*T <= target_rows, preferring >=2 grid steps."""
    divisors = [g for g in range(1, B + 1) if B % g == 0]
    ok = [g for g in divisors if g * T <= max(target_rows, T)]
    prefer = [g for g in ok if B // g >= 2]
    G = max(prefer) if prefer else max(ok)
    if (G * T) % 8 != 0 and G != B:
        # Keep the x/feat block sublane-aligned; fall back to one full-batch block.
        G = B
    return G


# ----------------------------------------------------------------------------
# Fused kernel: one grid step = G videos (R = G*T frame rows).
#   x block:  (R, C*H*W)
#   outputs:  cls (1, G, NC), attn (1, R, 1), tcam (1, R, NC)   (all exact)
# ----------------------------------------------------------------------------
def stpn2_fused_kernel(x_ref, wpe_ref, bp_ref, w1_ref, b1_ref, w2t_ref, b2_ref,
                       wcp_ref, bcp_ref, cls_ref, attn_ref, tcam_ref):
    G = cls_ref.shape[1]
    R = tcam_ref.shape[1]
    NC = tcam_ref.shape[2]
    T = R // G

    # Backbone stub: avgpool + linear projection folded into one K=C*HW matmul.
    x = x_ref[...].astype(jnp.float32)                                   # (R, CHW)
    feat = jnp.maximum(
        jnp.dot(x, wpe_ref[...], preferred_element_type=jnp.float32)
        + bp_ref[...], 0.0)                                              # (R, F)

    # attention_module: relu(fc1) -> sigmoid(fc2). fc2 has N=1 -> keep it off
    # the MXU: VPU broadcast-multiply + XLU lane reduction. b2 is an SMEM scalar.
    h = jnp.maximum(
        jnp.dot(feat, w1_ref[...], preferred_element_type=jnp.float32)
        + b1_ref[...], 0.0)                                              # (R, A)
    a = jax.nn.sigmoid(
        jnp.sum(h * w2t_ref[...], axis=-1, keepdims=True) + b2_ref[0])   # (R, 1)

    # Segment classifier: lane-dense (NCP=128) MXU matmul, then slice the
    # logits back to the NC real classes BEFORE any sigmoid / store.
    seg_logit = (jnp.dot(feat, wcp_ref[...], preferred_element_type=jnp.float32)
                 + bcp_ref[...])[:, :NC]                                 # (R, NC)
    tcam_ref[0] = jax.nn.sigmoid(seg_logit) * a                          # (R, NC)
    attn_ref[0] = a                                                      # (R, 1)

    # Video-level classifier, folded through the segment logits (exact):
    #   (sum_t a_t * feat_t) @ wc + bc == sum_t a_t * (seg_logit_t - bc) + bc
    # -> no M=1 matmul; plain sublane-group reduce over T (T % 8 == 0).
    bc = bcp_ref[...][:, :NC]                                            # (1, NC)
    weighted = a * (seg_logit - bc)                                      # (R, NC)
    vid = jnp.sum(weighted.reshape(G, T, NC), axis=1)                    # (G, NC)
    cls_ref[0] = jax.nn.sigmoid(vid + bc)                                # (G, NC)


# ----------------------------------------------------------------------------
# Wrapper
# ----------------------------------------------------------------------------
def stpn2_forward(x, params, *, target_rows=256):
    B, T, C, H, W = x.shape
    HW = H * W
    CHW = C * HW
    F_DIM = params["wp"].shape[1]
    A_DIM = params["w1"].shape[1]
    NC = params["wc"].shape[1]
    NCP = _round_up(NC, 128)

    G = _pick_group_size(B, T, target_rows)
    Bg = B // G
    R = G * T

    # Free reshape: frames as rows, C*H*W on the lane axis. No dtype cast here.
    x2d = x.reshape(B * T, CHW)

    # Fold the spatial average pool into the projection:
    #   mean_hw(x) @ wp == x_flat @ (repeat(wp, HW, axis=0) / HW)
    wpe = (jnp.repeat(params["wp"], HW, axis=0) / float(HW))             # (CHW, F)

    # Lane-pad the tiny classifier weight for a lane-dense MXU matmul only;
    # the kernel slices the logits back to NC before any store.
    wcp = jnp.pad(params["wc"], ((0, 0), (0, NCP - NC)))
    bcp = jnp.pad(params["bc"], ((0, 0), (0, NCP - NC)))
    w2t = params["w2"].T                                                 # (1, A)
    b2s = params["b2"].reshape(1)                                        # SMEM scalar

    cls_p, attn_p, tcam_p = pl.pallas_call(
        stpn2_fused_kernel,
        out_shape=(
            jax.ShapeDtypeStruct((Bg, G, NC), jnp.float32),   # cls
            jax.ShapeDtypeStruct((Bg, R, 1), jnp.float32),    # attn
            jax.ShapeDtypeStruct((Bg, R, NC), jnp.float32),   # tcam
        ),
        grid=(Bg,),
        in_specs=[
            pl.BlockSpec((R, CHW), lambda b: (b, 0)),         # x
            pl.BlockSpec((CHW, F_DIM), lambda b: (0, 0)),     # wp expanded
            pl.BlockSpec((1, F_DIM), lambda b: (0, 0)),       # bp
            pl.BlockSpec((F_DIM, A_DIM), lambda b: (0, 0)),   # w1
            pl.BlockSpec((1, A_DIM), lambda b: (0, 0)),       # b1
            pl.BlockSpec((1, A_DIM), lambda b: (0, 0)),       # w2^T
            pl.BlockSpec(memory_space=pltpu.MemorySpace.SMEM),  # b2 (scalar)
            pl.BlockSpec((F_DIM, NCP), lambda b: (0, 0)),     # wc (lane-padded)
            pl.BlockSpec((1, NCP), lambda b: (0, 0)),         # bc (lane-padded)
        ],
        out_specs=(
            pl.BlockSpec((1, G, NC), lambda b: (b, 0, 0)),
            pl.BlockSpec((1, R, 1), lambda b: (b, 0, 0)),
            pl.BlockSpec((1, R, NC), lambda b: (b, 0, 0)),
        ),
        compiler_params=pltpu.CompilerParams(
            dimension_semantics=("parallel",)),
    )(x2d, wpe, params["bp"], params["w1"], params["b1"], w2t, b2s, wcp, bcp)

    class_scores = cls_p.reshape(B, NC)          # (B, NC)
    attention_weights = attn_p.reshape(B, T)     # (B, T)
    tcam = tcam_p.reshape(B, T, NC)              # (B, T, NC)
    return class_scores, attention_weights, tcam


# ----------------------------------------------------------------------------
# Pure-JAX reference (semantics of STPN2.forward with the same backbone stub)
# ----------------------------------------------------------------------------
def stpn2_reference(x, p):
    B, T, C, H, W = x.shape
    pooled = x.reshape(B * T, C, H * W).astype(jnp.float32).mean(-1)
    feat = jax.nn.relu(pooled @ p["wp"] + p["bp"])
    h = jax.nn.relu(feat @ p["w1"] + p["b1"])
    a = jax.nn.sigmoid(h @ p["w2"] + p["b2"])                    # (B*T, 1)
    seg = jax.nn.sigmoid(feat @ p["wc"] + p["bc"])               # (B*T, NC)
    tcam = (seg * a).reshape(B, T, -1)
    attn = a.reshape(B, T)
    vid = (a * feat).reshape(B, T, -1).sum(1)
    cls = jax.nn.sigmoid(vid @ p["wc"] + p["bc"])
    return cls, attn, tcam


def init_params(key, c, feature_dim, attention_size, num_classes):
    ks = jax.random.split(key, 8)
    s = 0.05
    return {
        # backbone stub: avgpool + linear projection C -> feature_dim
        "wp": s * jax.random.normal(ks[0], (c, feature_dim), jnp.float32),
        "bp": s * jax.random.normal(ks[1], (1, feature_dim), jnp.float32),
        # attention_fc1 / attention_fc2
        "w1": s * jax.random.normal(ks[2], (feature_dim, attention_size), jnp.float32),
        "b1": s * jax.random.normal(ks[3], (1, attention_size), jnp.float32),
        "w2": s * jax.random.normal(ks[4], (attention_size, 1), jnp.float32),
        "b2": s * jax.random.normal(ks[5], (1, 1), jnp.float32),
        # classifier
        "wc": s * jax.random.normal(ks[6], (feature_dim, num_classes), jnp.float32),
        "bc": s * jax.random.normal(ks[7], (1, num_classes), jnp.float32),
    }


if __name__ == "__main__":
    # Small shapes consistent with the forward: (B, T, C, H, W)
    B, T, C, H, W = 2, 8, 4, 16, 16
    FEATURE_DIM, ATTN_SIZE, NUM_CLASSES = 128, 256, 1

    key = jax.random.PRNGKey(0)
    kx, kp = jax.random.split(key)
    x = jax.random.normal(kx, (B, T, C, H, W), jnp.float32)
    params = init_params(kp, C, FEATURE_DIM, ATTN_SIZE, NUM_CLASSES)

    cls, attn, tcam = jax.block_until_ready(stpn2_forward(x, params))
    cls_r, attn_r, tcam_r = stpn2_reference(x, params)

    assert cls.shape == (B, NUM_CLASSES)
    assert attn.shape == (B, T)
    assert tcam.shape == (B, T, NUM_CLASSES)
    # Tolerance accounts for MXU-vs-XLA f32 matmul precision differences and
    # the (exact-in-real-arithmetic) algebraic fold of the video classifier.
    np.testing.assert_allclose(np.asarray(cls), np.asarray(cls_r), rtol=5e-4, atol=5e-4)
    np.testing.assert_allclose(np.asarray(attn), np.asarray(attn_r), rtol=5e-4, atol=5e-4)
    np.testing.assert_allclose(np.asarray(tcam), np.asarray(tcam_r), rtol=5e-4, atol=5e-4)

    print("KERNEL_OK")
</pallas_src>

<mosaic_0001>
module attributes {stable_mosaic.version = 11 : i64} {
  func.func @stpn2_fused_kernel(%arg0: i32, %arg1: memref<8x1024xf32, #tpu.memory_space<vmem>>, %arg2: memref<1024x128xf32, #tpu.memory_space<vmem>>, %arg3: memref<1x128xf32, #tpu.memory_space<vmem>>, %arg4: memref<128x256xf32, #tpu.memory_space<vmem>>, %arg5: memref<1x256xf32, #tpu.memory_space<vmem>>, %arg6: memref<1x256xf32, #tpu.memory_space<vmem>>, %arg7: memref<1xf32, #tpu.memory_space<smem>>, %arg8: memref<128x128xf32, #tpu.memory_space<vmem>>, %arg9: memref<1x128xf32, #tpu.memory_space<vmem>>, %arg10: memref<1x1x1xf32, #tpu.memory_space<vmem>>, %arg11: memref<1x8x1xf32, #tpu.memory_space<vmem>>, %arg12: memref<1x8x1xf32, #tpu.memory_space<vmem>>) attributes {dimension_semantics = [#tpu.dimension_semantics<parallel>], iteration_bounds = array<i64: 2>, scalar_prefetch = 0 : i64, scratch_operands = 0 : i64, tpu.core_type = #tpu.core_type<tc>, window_params = [{transform_indices = @transform_0, window_bounds = array<i64: 8, 1024>}, {pipeline_mode = #tpu.pipeline_mode<synchronous>, transform_indices = @transform_1, window_bounds = array<i64: 1024, 128>}, {pipeline_mode = #tpu.pipeline_mode<synchronous>, transform_indices = @transform_2, window_bounds = array<i64: 1, 128>}, {pipeline_mode = #tpu.pipeline_mode<synchronous>, transform_indices = @transform_3, window_bounds = array<i64: 128, 256>}, {pipeline_mode = #tpu.pipeline_mode<synchronous>, transform_indices = @transform_4, window_bounds = array<i64: 1, 256>}, {pipeline_mode = #tpu.pipeline_mode<synchronous>, transform_indices = @transform_5, window_bounds = array<i64: 1, 256>}, {transform_indices = @transform_6, window_bounds = array<i64: 1>}, {pipeline_mode = #tpu.pipeline_mode<synchronous>, transform_indices = @transform_7, window_bounds = array<i64: 128, 128>}, {pipeline_mode = #tpu.pipeline_mode<synchronous>, transform_indices = @transform_8, window_bounds = array<i64: 1, 128>}, {transform_indices = @transform_9, window_bounds = array<i64: 1, 1, 1>}, {transform_indices = @transform_10, window_bounds = array<i64: 1, 8, 1>}, {transform_indices = @transform_11, window_bounds = array<i64: 1, 8, 1>}]} {
    %c0 = arith.constant 0 : index
    %c0_0 = arith.constant 0 : index
    %0 = vector.load %arg1[%c0, %c0_0] : memref<8x1024xf32, #tpu.memory_space<vmem>>, vector<8x1024xf32>
    %c0_1 = arith.constant 0 : index
    %c0_2 = arith.constant 0 : index
    %1 = vector.load %arg2[%c0_1, %c0_2] : memref<1024x128xf32, #tpu.memory_space<vmem>>, vector<1024x128xf32>
    %cst = arith.constant dense<0.000000e+00> : vector<8x128xf32>
    %2 = tpu.matmul %0, %1, %cst {dimension_numbers = #tpu.dot_dimension_numbers<[1], [0], [0], [1], [0, 0, 1, 1], [], []>} : vector<8x1024xf32>, vector<1024x128xf32>, vector<8x128xf32> -> vector<8x128xf32>
    %c0_3 = arith.constant 0 : index
    %c0_4 = arith.constant 0 : index
    %3 = vector.load %arg3[%c0_3, %c0_4] : memref<1x128xf32, #tpu.memory_space<vmem>>, vector<1x128xf32>
    %4 = vector.broadcast %3 : vector<1x128xf32> to vector<8x128xf32>
    %5 = arith.addf %2, %4 : vector<8x128xf32>
    %cst_5 = arith.constant 0.000000e+00 : f32
    %6 = vector.broadcast %cst_5 : f32 to vector<8x128xf32>
    %7 = arith.maximumf %5, %6 : vector<8x128xf32>
    %c0_6 = arith.constant 0 : index
    %c0_7 = arith.constant 0 : index
    %8 = vector.load %arg4[%c0_6, %c0_7] : memref<128x256xf32, #tpu.memory_space<vmem>>, vector<128x256xf32>
    %cst_8 = arith.constant dense<0.000000e+00> : vector<8x256xf32>
    %9 = tpu.matmul %7, %8, %cst_8 {dimension_numbers = #tpu.dot_dimension_numbers<[1], [0], [0], [1], [0, 0, 1, 1], [], []>} : vector<8x128xf32>, vector<128x256xf32>, vector<8x256xf32> -> vector<8x256xf32>
    %c0_9 = arith.constant 0 : index
    %c0_10 = arith.constant 0 : index
    %10 = vector.load %arg5[%c0_9, %c0_10] : memref<1x256xf32, #tpu.memory_space<vmem>>, vector<1x256xf32>
    %11 = vector.broadcast %10 : vector<1x256xf32> to vector<8x256xf32>
    %12 = arith.addf %9, %11 : vector<8x256xf32>
    %cst_11 = arith.constant 0.000000e+00 : f32
    %13 = vector.broadcast %cst_11 : f32 to vector<8x256xf32>
    %14 = arith.maximumf %12, %13 : vector<8x256xf32>
    %c0_12 = arith.constant 0 : index
    %c0_13 = arith.constant 0 : index
    %15 = vector.load %arg6[%c0_12, %c0_13] : memref<1x256xf32, #tpu.memory_space<vmem>>, vector<1x256xf32>
    %16 = vector.broadcast %15 : vector<1x256xf32> to vector<8x256xf32>
    %17 = arith.mulf %14, %16 : vector<8x256xf32>
    %cst_14 = arith.constant dense<0.000000e+00> : vector<8xf32>
    %18 = vector.multi_reduction <add>, %17, %cst_14 [1] : vector<8x256xf32> to vector<8xf32>
    %19 = vector.shape_cast %18 : vector<8xf32> to vector<8x1xf32>
    %c0_15 = arith.constant 0 : index
    %20 = memref.load %arg7[%c0_15] : memref<1xf32, #tpu.memory_space<smem>>
    %21 = vector.broadcast %20 : f32 to vector<8x1xf32>
    %22 = arith.addf %19, %21 : vector<8x1xf32>
    %23 = arith.negf %22 : vector<8x1xf32>
    %24 = math.exp %23 : vector<8x1xf32>
    %cst_16 = arith.constant 1.000000e+00 : f32
    %25 = vector.broadcast %cst_16 : f32 to vector<8x1xf32>
    %26 = arith.addf %25, %24 : vector<8x1xf32>
    %27 = arith.divf %25, %26 : vector<8x1xf32>
    %c0_17 = arith.constant 0 : index
    %c0_18 = arith.constant 0 : index
    %28 = vector.load %arg8[%c0_17, %c0_18] : memref<128x128xf32, #tpu.memory_space<vmem>>, vector<128x128xf32>
    %cst_19 = arith.constant dense<0.000000e+00> : vector<8x128xf32>
    %29 = tpu.matmul %7, %28, %cst_19 {dimension_numbers = #tpu.dot_dimension_numbers<[1], [0], [0], [1], [0, 0, 1, 1], [], []>} : vector<8x128xf32>, vector<128x128xf32>, vector<8x128xf32> -> vector<8x128xf32>
    %c0_20 = arith.constant 0 : index
    %c0_21 = arith.constant 0 : index
    %30 = vector.load %arg9[%c0_20, %c0_21] : memref<1x128xf32, #tpu.memory_space<vmem>>, vector<1x128xf32>
    %31 = vector.broadcast %30 : vector<1x128xf32> to vector<8x128xf32>
    %32 = arith.addf %29, %31 : vector<8x128xf32>
    %33 = vector.extract_strided_slice %32 {offsets = [0, 0], sizes = [8, 1], strides = [1, 1]} : vector<8x128xf32> to vector<8x1xf32>
    %34 = arith.negf %33 : vector<8x1xf32>
    %35 = math.exp %34 : vector<8x1xf32>
    %cst_22 = arith.constant 1.000000e+00 : f32
    %36 = vector.broadcast %cst_22 : f32 to vector<8x1xf32>
    %37 = arith.addf %36, %35 : vector<8x1xf32>
    %38 = arith.divf %36, %37 : vector<8x1xf32>
    %39 = arith.mulf %38, %27 : vector<8x1xf32>
    %c0_23 = arith.constant 0 : index
    %c0_24 = arith.constant 0 : index
    %c0_25 = arith.constant 0 : index
    %40 = vector.load %arg12[%c0_23, %c0_24, %c0_25] : memref<1x8x1xf32, #tpu.memory_space<vmem>>, vector<1x8x1xf32>
    %41 = vector.shape_cast %40 : vector<1x8x1xf32> to vector<8x1xf32>
    %42 = vector.shape_cast %39 : vector<8x1xf32> to vector<1x8x1xf32>
    tpu.vector_store %arg12[%c0_23, %c0_24, %c0_25], %42 {strides = array<i32>} : memref<1x8x1xf32, #tpu.memory_space<vmem>>, vector<1x8x1xf32>,
    %c0_26 = arith.constant 0 : index
    %c0_27 = arith.constant 0 : index
    %c0_28 = arith.constant 0 : index
    %43 = vector.load %arg11[%c0_26, %c0_27, %c0_28] : memref<1x8x1xf32, #tpu.memory_space<vmem>>, vector<1x8x1xf32>
    %44 = vector.shape_cast %43 : vector<1x8x1xf32> to vector<8x1xf32>
    %45 = vector.shape_cast %27 : vector<8x1xf32> to vector<1x8x1xf32>
    tpu.vector_store %arg11[%c0_26, %c0_27, %c0_28], %45 {strides = array<i32>} : memref<1x8x1xf32, #tpu.memory_space<vmem>>, vector<1x8x1xf32>,
    %c0_29 = arith.constant 0 : index
    %c0_30 = arith.constant 0 : index
    %46 = vector.load %arg9[%c0_29, %c0_30] : memref<1x128xf32, #tpu.memory_space<vmem>>, vector<1x128xf32>
    %47 = vector.extract_strided_slice %46 {offsets = [0, 0], sizes = [1, 1], strides = [1, 1]} : vector<1x128xf32> to vector<1x1xf32>
    %48 = vector.broadcast %47 : vector<1x1xf32> to vector<8x1xf32>
    %49 = arith.subf %33, %48 : vector<8x1xf32>
    %50 = arith.mulf %27, %49 : vector<8x1xf32>
    %51 = vector.shape_cast %50 : vector<8x1xf32> to vector<1x8x1xf32>
    %cst_31 = arith.constant dense<0.000000e+00> : vector<1x1xf32>
    %52 = vector.multi_reduction <add>, %51, %cst_31 [1] : vector<1x8x1xf32> to vector<1x1xf32>
    %53 = arith.addf %52, %47 : vector<1x1xf32>
    %54 = arith.negf %53 : vector<1x1xf32>
    %55 = math.exp %54 : vector<1x1xf32>
    %cst_32 = arith.constant 1.000000e+00 : f32
    %56 = vector.broadcast %cst_32 : f32 to vector<1x1xf32>
    %57 = arith.addf %56, %55 : vector<1x1xf32>
    %58 = arith.divf %56, %57 : vector<1x1xf32>
    %c0_33 = arith.constant 0 : index
    %c0_34 = arith.constant 0 : index
    %c0_35 = arith.constant 0 : index
    %59 = vector.load %arg10[%c0_33, %c0_34, %c0_35] : memref<1x1x1xf32, #tpu.memory_space<vmem>>, vector<1x1x1xf32>
    %60 = vector.shape_cast %59 : vector<1x1x1xf32> to vector<1x1xf32>
    %61 = vector.shape_cast %58 : vector<1x1xf32> to vector<1x1x1xf32>
    tpu.vector_store %arg10[%c0_33, %c0_34, %c0_35], %61 {strides = array<i32>} : memref<1x1x1xf32, #tpu.memory_space<vmem>>, vector<1x1x1xf32>,
    return
  }
  func.func @transform_0(%arg0: i32) -> (i32, i32) {
    %c0_i32 = arith.constant 0 : i32
    %c0_i32_0 = arith.constant 0 : i32
    return %arg0, %c0_i32 : i32, i32
  }
  func.func @transform_1(%arg0: i32) -> (i32, i32) {
    %c0_i32 = arith.constant 0 : i32
    %c0_i32_0 = arith.constant 0 : i32
    %c0_i32_1 = arith.constant 0 : i32
    return %c0_i32, %c0_i32_0 : i32, i32
  }
  func.func @transform_2(%arg0: i32) -> (i32, i32) {
    %c0_i32 = arith.constant 0 : i32
    %c0_i32_0 = arith.constant 0 : i32
    %c0_i32_1 = arith.constant 0 : i32
    return %c0_i32, %c0_i32_0 : i32, i32
  }
  func.func @transform_3(%arg0: i32) -> (i32, i32) {
    %c0_i32 = arith.constant 0 : i32
    %c0_i32_0 = arith.constant 0 : i32
    %c0_i32_1 = arith.constant 0 : i32
    return %c0_i32, %c0_i32_0 : i32, i32
  }
  func.func @transform_4(%arg0: i32) -> (i32, i32) {
    %c0_i32 = arith.constant 0 : i32
    %c0_i32_0 = arith.constant 0 : i32
    %c0_i32_1 = arith.constant 0 : i32
    return %c0_i32, %c0_i32_0 : i32, i32
  }
  func.func @transform_5(%arg0: i32) -> (i32, i32) {
    %c0_i32 = arith.constant 0 : i32
    %c0_i32_0 = arith.constant 0 : i32
    %c0_i32_1 = arith.constant 0 : i32
    return %c0_i32, %c0_i32_0 : i32, i32
  }
  func.func @transform_6(%arg0: i32) -> i32 {
    %c0_i32 = arith.constant 0 : i32
    %c0_i32_0 = arith.constant 0 : i32
    return %c0_i32 : i32
  }
  func.func @transform_7(%arg0: i32) -> (i32, i32) {
    %c0_i32 = arith.constant 0 : i32
    %c0_i32_0 = arith.constant 0 : i32
    %c0_i32_1 = arith.constant 0 : i32
    return %c0_i32, %c0_i32_0 : i32, i32
  }
  func.func @transform_8(%arg0: i32) -> (i32, i32) {
    %c0_i32 = arith.constant 0 : i32
    %c0_i32_0 = arith.constant 0 : i32
    %c0_i32_1 = arith.constant 0 : i32
    return %c0_i32, %c0_i32_0 : i32, i32
  }
  func.func @transform_9(%arg0: i32) -> (i32, i32, i32) {
    %c0_i32 = arith.constant 0 : i32
    %c0_i32_0 = arith.constant 0 : i32
    %c0_i32_1 = arith.constant 0 : i32
    return %arg0, %c0_i32, %c0_i32_0 : i32, i32, i32
  }
  func.func @transform_10(%arg0: i32) -> (i32, i32, i32) {
    %c0_i32 = arith.constant 0 : i32
    %c0_i32_0 = arith.constant 0 : i32
    %c0_i32_1 = arith.constant 0 : i32
    return %arg0, %c0_i32, %c0_i32_0 : i32, i32, i32
  }
  func.func @transform_11(%arg0: i32) -> (i32, i32, i32) {
    %c0_i32 = arith.constant 0 : i32
    %c0_i32_0 = arith.constant 0 : i32
    %c0_i32_1 = arith.constant 0 : i32
    return %arg0, %c0_i32, %c0_i32_0 : i32, i32, i32
  }
}

</mosaic_0001>

<bundles_post_ra>
// kernel: tpu_custom_call.1
= control target key start
LH: loop header
LB: loop body
LE: loop exit
PB: predicated region body
PF: predicated region fallthrough
CT: control target
= control target key end

     0   :  { %s2276_s0 = inlined_call_operand.hbm [shape: f32[16,1024], index: 0, kind: input, shape index: {}]   ;;  %s2277_s1 = inlined_call_operand.hbm [shape: f32[1024,128], index: 1, kind: input, shape index: {}]   ;;  %s2278_s2 = inlined_call_operand.vmem [shape: f32[1,128], index: 2, kind: input, shape index: {}]   ;;  %s2279_s3 = inlined_call_operand.hbm [shape: f32[128,256], index: 3, kind: input, shape index: {}]   ;;  %s2280_s4 = inlined_call_operand.vmem [shape: f32[1,256], index: 4, kind: input, shape index: {}]   ;;  %s2281_s5 = inlined_call_operand.vmem [shape: f32[1,256], index: 5, kind: input, shape index: {}]   ;;  %s2282_s6 = inlined_call_operand.<no memory space> [shape: f32[1], index: 6, kind: input, shape index: {}]   ;;  %s2283_s7 = inlined_call_operand.hbm [shape: f32[128,128], index: 7, kind: input, shape index: {}]   ;;  %s2284_s8 = inlined_call_operand.vmem [shape: f32[1,128], index: 8, kind: input, shape index: {}]   ;;  %s2285_s9 = inlined_call_operand.vmem [shape: f32[2,1,1], index: 9, kind: output, shape index: {0}]   ;;  %s2286_s10 = inlined_call_operand.vmem [shape: f32[2,8,1], index: 10, kind: output, shape index: {1}]   ;;  %s2287_s11 = inlined_call_operand.vmem [shape: f32[2,8,1], index: 11, kind: output, shape index: {2}]  }
   0x1   :  { %2293 = sst [smem:[#allocation13_spill]] %s2277_s1 }
   0x2   :  { %2294 = sst [smem:[#allocation14_spill]] %s2285_s9 }
   0x3   :  { %2295 = sst [smem:[#allocation15_spill]] %s2287_s11 }
   0x4   :  { %17 = sst [smem:[#allocation2]] %s2282_s6 }
   0x5   :  { %18 = vsyncpa [#allocation4], 0 }
   0x6   :  { %20 = vsyncpa [#allocation4 + $0x1], 0 }
   0x7   :  { %21 = vsyncpa [#allocation6], 0 }
   0x8   :  { %22 = vsyncpa [#allocation9], 0  ;;  %s2033_s19 = smov 0   ;;  %s2035_s20 = smov 0  }
   0x9   :  { %s2037_s21 = smov 0   ;;  %s2039_s22 = smov 0  }
   0xa LB: > { %s2052_s6 = sadd.s32 4294967295, %s1957_s22   ;;  %p48_p0 = scmp.ne.s32.totalorder %s1949_s20, %s1945_s19  ;;  %s1957_s22 = sphi %s2039_s22, %s2315_s22   ;;  %s1953_s21 = sphi %s2037_s21, %s2314_s21   ;;  %s1949_s20 = sphi %s2035_s20, %s2313_s20   ;;  %s1945_s19 = sphi %s2033_s19, %s2312_s19  }
   0xb   : > { %p2288_p1 = scmp.eq.s32.totalorder %s2052_s6, 0  ;;  %p1313_p2 = scmp.ge.s32.totalorder %s1957_s22, 1 }
   0xc   : > { %p305_p3 = scmp.lt.s32.totalorder %s1957_s22, 3  ;;  %s1959_s25 = smov [#allocation5]  }
   0xd   : > { %p2060_p4 = por %p2288_p1, %p48_p0  ;;  %s317_s26 = sshll.u32 %s1959_s25, 4  ;;  %s318_s26 = int_to_ptr.vmem [resolvable:$true] %s317_s26 }
   0xe   : > { %p2064_p5 = pnand %p1313_p2, %p305_p3  ;;  %s1960_s28 = smov [#allocation7]  }
   0xf   : > { %s2296_s23 = scalar_select %p2060_p4, 1, 0 }
  0x10   : > { %s2297_s24 = scalar_select %p2064_p5, 1, 0 }
  0x11   : > { %p1726_p6 = pneg %p2064_p5  ;;  %s333_s29 = sshll.u32 %s1960_s28, 4  ;;  %s2076_s29 = int_to_ptr.vmem [resolvable:$true] %s333_s29 }
  0x12   : > { %s2299_s1 = sld [smem:[#allocation13_spill]] }
  0x13   : > { %p2072_p7 = pnand %p1726_p6, %p2288_p1 }
  0x15   : > { %p2086_p9 = pneg %p2072_p7 }
  0x18   : > { %s1801_s13 = scalar_lea.hbm %s2299_s1, 16384 }
  0x19   : > { %p1802_p8 = scmp.ne.s32.totalorder %s2299_s1, %s1801_s13  ;;  %p1808_p12 = scmp.lt.u32.totalorder %s1801_s13, %s2299_s1 }
  0x1b   : > { %p1804_p10 = pnand %p2086_p9, %p1802_p8 }
  0x1d   : > { %p1805_p11 = pneg %p1804_p10 }
  0x1f   : > { %p1810_p13 = pnand %p1808_p12, %p1805_p11 }
  0x21   : > { %1813 = shalt.err (!%p1810_p13)
}
  0x22   : > { %s1814_s19 = scalar_lea.vmem %s318_s26, 16384  ;;  %p1822_p6 = scmp.lt.s32.totalorder %s318_s26, %s318_s26 }
  0x23   : > { %p1815_p0 = scmp.ne.s32.totalorder %s318_s26, %s1814_s19  ;;  %p1823_p1 = scmp.lt.s32.totalorder %s1814_s19, %s1814_s19 }
  0x25   : > { %p1817_p2 = pnand %p1815_p0, %p2086_p9  ;;  %p1824_p4 = por %p1823_p1, %p1822_p6 }
  0x27   : > { %p1818_p3 = pneg %p1817_p2 }
  0x29   : > { %p1825_p5 = pnand %p1824_p4, %p1818_p3 }
  0x2b   : > { %1828 = shalt.err (!%p1825_p5)
}
  0x2c   : > { %s2291_s25 = smov 128   ;;  %s2292_s28 = smov 8  }
  0x2d   : > { %1729 = dma.hbm_to_vmem [thread:$0]  (!%p2072_p7), %s2299_s1, 16384, %s318_s26, [#allocation6], %s2291_s25, %s2291_s25, %s2292_s28  }
  0x2e   : > { %s1829_s15 = scalar_lea.hbm %s2279_s3, 4096 }
  0x2f   : > { %p1830_p1 = scmp.ne.s32.totalorder %s2279_s3, %s1829_s15  ;;  %p1836_p8 = scmp.lt.u32.totalorder %s1829_s15, %s2279_s3 }
  0x31   : > { %p1832_p4 = pnand %p1830_p1, %p2086_p9 }
  0x33   : > { %p1833_p5 = pneg %p1832_p4 }
  0x35   : > { %p1838_p10 = pnand %p1836_p8, %p1833_p5 }
  0x37   : > { %1841 = shalt.err (!%p1838_p10)
}
  0x38   : > { %s1842_s26 = scalar_lea.vmem %s2076_s29, 4096  ;;  %p1850_p0 = scmp.lt.s32.totalorder %s2076_s29, %s2076_s29 }
  0x39   : > { %p1843_p11 = scmp.ne.s32.totalorder %s2076_s29, %s1842_s26  ;;  %p1851_p2 = scmp.lt.s32.totalorder %s1842_s26, %s1842_s26 }
  0x3b   : > { %p1845_p12 = pnand %p1843_p11, %p2086_p9  ;;  %p1852_p3 = por %p1851_p2, %p1850_p0 }
  0x3d   : > { %p1846_p13 = pneg %p1845_p12 }
  0x3f   : > { %p1853_p6 = pnand %p1852_p3, %p1846_p13 }
  0x41   : > { %1856 = shalt.err (!%p1853_p6)
}
  0x42   : > { %s1963_s30 = smov 256   ;;  %s1964_s9 = smov 16  }
  0x43   : > { %1732 = dma.hbm_to_vmem [thread:$0]  (!%p2072_p7), %s2279_s3, 4096, %s2076_s29, [#allocation6], %s1963_s30, %s1963_s30, %s1964_s9  }
  0x44   : > { %s1965_s14 = smov [#allocation8]   ;;  %s2129_s17 = sadd.s32 1, %s1957_s22  }
  0x45   : > { %s355_s15 = sshll.u32 %s1965_s14, 4  ;;  %s1857_s26 = scalar_lea.hbm %s2283_s7, 2048  ;;  %s356_s15 = int_to_ptr.vmem [resolvable:$true] %s355_s15 }
  0x46   : > { %p1858_p1 = scmp.ne.s32.totalorder %s2283_s7, %s1857_s26  ;;  %p1864_p8 = scmp.lt.u32.totalorder %s1857_s26, %s2283_s7 }
  0x48   : > { %p1860_p4 = pnand %p1858_p1, %p2086_p9 }
  0x4a   : > { %p1861_p5 = pneg %p1860_p4 }
  0x4c   : > { %p1866_p10 = pnand %p1864_p8, %p1861_p5 }
  0x4e   : > { %1869 = shalt.err (!%p1866_p10)
}
  0x4f   : > { %s1870_s29 = scalar_lea.vmem %s356_s15, 2048  ;;  %p1878_p0 = scmp.lt.s32.totalorder %s356_s15, %s356_s15 }
  0x50   : > { %p1871_p11 = scmp.ne.s32.totalorder %s356_s15, %s1870_s29  ;;  %p1879_p2 = scmp.lt.s32.totalorder %s1870_s29, %s1870_s29 }
  0x52   : > { %p1873_p12 = pnand %p1871_p11, %p2086_p9  ;;  %p1880_p3 = por %p1879_p2, %p1878_p0 }
  0x54   : > { %p1874_p13 = pneg %p1873_p12 }
  0x56   : > { %p1881_p6 = pnand %p1880_p3, %p1874_p13 }
  0x58   : > { %1884 = shalt.err (!%p1881_p6)
}
  0x59   : > { %s2301_s25 = smov 8   ;;  %s2302_s28 = smov 128  }
  0x5a   : > { %1735 = dma.hbm_to_vmem [thread:$0]  (!%p2072_p7), %s2283_s7, 2048, %s356_s15, [#allocation9], %s2302_s28, %s2302_s28, %s2301_s25  }
  0x5b   : > { %s32_s16 = ssub.s32 %s1957_s22, %s2129_s17  ;;  %s35_s30 = sadd.s32 1, %s1953_s21 }
  0x5c   : > { %p33_p9 = scmp.eq.s32.totalorder %s32_s16, 0  ;;  %p42_p1 = scmp.ne.s32.totalorder %s1953_s21, %s1949_s20 }
  0x5d   : > { %p43_p4 = scmp.eq.s32.totalorder %s1957_s22, 0  ;;  %p1743_p5 = scmp.lt.s32.totalorder %s1957_s22, 2 }
  0x5e   : > { %s2160_s27 = scalar_select %p33_p9, %s1953_s21, %s35_s30  }
  0x5f   : > { %p44_p8 = por %p43_p4, %p42_p1  ;;  %s372_s9 = sand.u32 1, %s1953_s21  }
  0x60   : > { %s1318_s12 = sshll.u32 %s372_s9, 6  ;;  %s1335_s13 = sshll.u32 %s1957_s22, 10 }
  0x61   : > { %s2167_s19 = scalar_lea.hbm %s2276_s0, %s1335_s13  ;;  %s376_s15 = scalar_lea.vmem [#allocation3], %s1318_s12 }
  0x62   : > { %s384_s26 = sshll.u32 %s376_s15, 4  ;;  %p2171_p7 = pnand %p1743_p5, %p44_p8  ;;  %s2169_s26 = int_to_ptr.vmem [resolvable:$true] %s384_s26 }
  0x63   : > { %s373_s22 = scalar_lea.sflag [#allocation4], %s372_s9  ;;  %s1885_s25 = scalar_lea.hbm %s2167_s19, 1024 }
  0x64   : > { %p1886_p10 = scmp.ne.s32.totalorder %s2167_s19, %s1885_s25  ;;  %p1887_p11 = pneg %p2171_p7 }
  0x65   : > { %s1890_s11 = scalar_lea.hbm %s2276_s0, 2048  ;;  %p1891_p0 = scmp.lt.u32.totalorder %s2167_s19, %s2276_s0 }
  0x66   : > { %p1888_p12 = pnand %p1887_p11, %p1886_p10  ;;  %p1892_p2 = scmp.lt.u32.totalorder %s1890_s11, %s1885_s25 }
  0x67   : > { %p1894_p6 = scmp.lt.u32.totalorder %s1885_s25, %s2167_s19 }
  0x68   : > { %p1889_p13 = pneg %p1888_p12  ;;  %p1893_p3 = por %p1892_p2, %p1891_p0 }
  0x6a   : > { %p1895_p9 = por %p1894_p6, %p1893_p3 }
  0x6c   : > { %p1896_p1 = pnand %p1895_p9, %p1889_p13 }
  0x6e   : > { %1899 = shalt.err (!%p1896_p1)
}
  0x6f   : > { %s1900_s9 = scalar_lea.vmem %s2169_s26, 1024  ;;  %s1966_s12 = smov [#allocation3]  }
  0x70   : > { %p1901_p4 = scmp.ne.s32.totalorder %s2169_s26, %s1900_s9  ;;  %s1905_s13 = sshll.u32 %s1966_s12, 4  ;;  %s1906_s13 = int_to_ptr.vmem [resolvable:$false] %s1905_s13 }
  0x71   : > { %s1907_s14 = scalar_lea.vmem %s1906_s13, 2048  ;;  %p1908_p10 = scmp.lt.s32.totalorder %s2169_s26, %s1906_s13 }
  0x72   : > { %p1903_p5 = pnand %p1901_p4, %p1887_p11  ;;  %p1909_p12 = scmp.lt.s32.totalorder %s1907_s14, %s1900_s9 }
  0x74   : > { %p1904_p8 = pneg %p1903_p5  ;;  %p1910_p0 = por %p1909_p12, %p1908_p10 }
  0x76   : > { %p1911_p2 = pnand %p1910_p0, %p1904_p8 }
  0x78   : > { %1914 = shalt.err (!%p1911_p2)
}
  0x79   : > { %1739 = dma.hbm_to_vmem [thread:$0]  (!%p2171_p7), %s2167_s19, 1024, %s2169_s26, %s373_s22  }
  0x7a   : > { %p2304_p13 = scmp.ne.s32.totalorder %s2297_s24, 0 }
  0x7b   : > { %s395_s18 = sand.u32 (!%p2304_p13), 1, %s1949_s20   ;;  %p2305_p11 = scmp.ne.s32.totalorder (!%p2304_p13), %s2296_s23, 0 }
  0x7c   : > { %393 = sbr.rel (%p2304_p13) target bundleno = 861 (0x35d), region = 56  ;;  %s1322_s15 = sshll.u32 (!%p2304_p13), %s395_s18, 6 }
  0x7d   : > { %s396_s25 = scalar_lea.sflag (!%p2304_p13), [#allocation4], %s395_s18  ;;  %s2203_s28 = scalar_lea.vmem (!%p2304_p13), [#allocation3], %s1322_s15 }
  0x83   : > { %1932 = dma.done.wait (%p2305_p11), %s396_s25, 1024  }
  0x84   : > { %1934 = vsyncadd (%p2305_p11), %s396_s25, 4294966272  ;;  %p2306_p3 = scmp.eq.s32.totalorder %s2052_s6, 0 }
  0x86   : > { %1936 = dma.done.wait (%p2306_p3), [#allocation6], 20480   ;;  %p2307_p7 = pmov %p2306_p3 }
  0x87   : > { %p2308_p6 = pmov %p2306_p3 }
  0x88   : > { %1938 = vsyncadd (%p2307_p7), [#allocation6], 4294946816 }
  0x89   : > { %1940 = dma.done.wait (%p2308_p6), [#allocation9], 2048   ;;  %p2309_p9 = pmov %p2306_p3 }
  0x8a   : > { %v491_v0 = vld [vmem:[#allocation5 + $0x80] sm:$0xff]  ;;  %v492_v1 = vld [vmem:[#allocation5 + $0x88] sm:$0xff]  ;;  %v493_v11 = vld [vmem:[#allocation5 + $0x90] sm:$0xff]  ;;  %vm1969_vm0 = vmmov 0   ;;  %s1025_s16 = sld [smem:[#allocation2]]  ;;  %p456_p1 = scmp.lt.s32.totalorder %s2052_s6, 1 }
  0x8b   : > { %1942 = vsyncadd (%p2309_p9), [#allocation9], 4294965248  ;;  %v475_v2 = vld [vmem:[#allocation5] sm:$0xff]  ;;  %v1528_v3 = vpack.c.bf16 %v492_v1, %v491_v0  ;;  %v476_v4 = vld [vmem:[#allocation5 + $0x8] sm:$0xff]  ;;  %vm1134_vm1 = vcmask 7168   ;;  %s2311_s26 = sld [smem:[#allocation14_spill]] }
  0x8c   : > { %v523_v5 = vld [vmem:[#allocation5 + $0x180] sm:$0xff]  ;;  %v524_v6 = vld [vmem:[#allocation5 + $0x188] sm:$0xff]  ;;  %v1530_v7 = vpack.c.bf16 %v476_v4, %v475_v2  ;;  %v494_v13 = vld [vmem:[#allocation5 + $0x98] sm:$0xff]  ;;  %s2317_s6 = smov (!%p456_p1, %s2052_s6), 1  ;;  %vm1160_vm2 = vcmask 0  }
  0x8d   : > { %v1560_v8 = vpack.c.bf16 %v524_v6, %v523_v5  ;;  %v507_v9 = vld [vmem:[#allocation5 + $0x100] sm:$0xff]  ;;  %v508_v10 = vld [vmem:[#allocation5 + $0x108] sm:$0xff]  ;;  %1529 = vmatprep.subr.bf16.mxu0 %v1528_v3  ;;  %v477_v14 = vld [vmem:[#allocation5 + $0x10] sm:$0xff]  ;;  %v1532_v16 = vpack.c.bf16 %v494_v13, %v493_v11  ;;  %s1326_s12 = sshll.u32 %s2317_s6, 3 }
  0x8e   : > { %v1562_v12 = vpack.c.bf16 %v508_v10, %v507_v9  ;;  %v478_v15 = vld [vmem:[#allocation5 + $0x18] sm:$0xff]  ;;  %1531 = vmatpush3.bf16.msra.mxu0 %v1530_v7  ;;  %v525_v18 = vld [vmem:[#allocation5 + $0x190] sm:$0xff]  ;;  %v495_v23 = vld [vmem:[#allocation5 + $0xa0] sm:$0xff]  ;;  %s462_s18 = scalar_lea.vmem %s2286_s10, %s1326_s12 }
  0x8f   : > { %1561 = vmatprep.subr.bf16.mxu1 %v1560_v8  ;;  %v1534_v17 = vpack.c.bf16 %v478_v15, %v477_v14  ;;  %v526_v19 = vld [vmem:[#allocation5 + $0x198] sm:$0xff]  ;;  %v509_v20 = vld [vmem:[#allocation5 + $0x110] sm:$0xff]  ;;  %v496_v24 = vld [vmem:[#allocation5 + $0xa8] sm:$0xff]  ;;  %1533 = vmatprep.subr.bf16.mxu0 %v1532_v16 }
  0x90   : > { %1563 = vmatpush3.bf16.msra.mxu1 %v1562_v12  ;;  %v1564_v21 = vpack.c.bf16 %v526_v19, %v525_v18  ;;  %v510_v22 = vld [vmem:[#allocation5 + $0x118] sm:$0xff]  ;;  %v1536_v26 = vpack.c.bf16 %v496_v24, %v495_v23  ;;  %v479_v27 = vld [vmem:[#allocation5 + $0x20] sm:$0xff]  ;;  %v480_v28 = vld [vmem:[#allocation5 + $0x28] sm:$0xff] }
  0x91   : > { %v1566_v25 = vpack.c.bf16 %v510_v22, %v509_v20  ;;  %v527_v29 = vld [vmem:[#allocation5 + $0x1a0] sm:$0xff]  ;;  %v528_v30 = vld [vmem:[#allocation5 + $0x1a8] sm:$0xff]  ;;  %v1538_v33 = vpack.c.bf16 %v480_v28, %v479_v27  ;;  %v497_v35 = vld [vmem:[#allocation5 + $0xb0] sm:$0xff]  ;;  %s458_s29 = scalar_lea.vmem %s2311_s26, %s2317_s6 }
  0x92   : > { %1565 = vmatprep.subr.bf16.mxu1 %v1564_v21  ;;  %v511_v31 = vld [vmem:[#allocation5 + $0x120] sm:$0xff]  ;;  %v512_v32 = vld [vmem:[#allocation5 + $0x128] sm:$0xff]  ;;  %1535 = vmatpush3.bf16.msra.mxu0 %v1534_v17  ;;  %v1568_v34 = vpack.c.bf16 %v528_v30, %v527_v29  ;;  %v498_v36 = vld [vmem:[#allocation5 + $0xb8] sm:$0xff] }
  0x93   : > { %v481_v37 = vld [vmem:[#allocation5 + $0x30] sm:$0xff]  ;;  %1537 = vmatprep.subr.bf16.mxu0 %v1536_v26  ;;  %v1570_v38 = vpack.c.bf16 %v512_v32, %v511_v31  ;;  %v1540_v39 = vpack.c.bf16 %v498_v36, %v497_v35  ;;  %v482_v40 = vld [vmem:[#allocation5 + $0x38] sm:$0xff]  ;;  %v499_v46 = vld [vmem:[#allocation5 + $0xc0] sm:$0xff] }
  0x94   : > { %1567 = vmatpush3.bf16.msra.mxu1 %v1566_v25  ;;  %v529_v41 = vld [vmem:[#allocation5 + $0x1b0] sm:$0xff]  ;;  %v530_v42 = vld [vmem:[#allocation5 + $0x1b8] sm:$0xff]  ;;  %v500_v47 = vld [vmem:[#allocation5 + $0xc8] sm:$0xff]  ;;  %v1542_v48 = vpack.c.bf16 %v482_v40, %v481_v37 }
  0x95   : > { %1569 = vmatprep.subr.bf16.mxu1 %v1568_v34  ;;  %v1572_v43 = vpack.c.bf16 %v530_v42, %v529_v41  ;;  %v513_v44 = vld [vmem:[#allocation5 + $0x130] sm:$0xff]  ;;  %v514_v45 = vld [vmem:[#allocation5 + $0x138] sm:$0xff]  ;;  %v531_v49 = vld [vmem:[#allocation5 + $0x1c0] sm:$0xff]  ;;  %v1544_v52 = vpack.c.bf16 %v500_v47, %v499_v46 }
  0x96   : > { %1539 = vmatpush3.bf16.msra.mxu0 %v1538_v33  ;;  %v532_v50 = vld [vmem:[#allocation5 + $0x1c8] sm:$0xff]  ;;  %v1574_v51 = vpack.c.bf16 %v514_v45, %v513_v44  ;;  %v483_v53 = vld [vmem:[#allocation5 + $0x40] sm:$0xff]  ;;  %v501_v58 = vld [vmem:[#allocation5 + $0xd0] sm:$0xff] }
  0x97   : > { %1541 = vmatprep.subr.bf16.mxu0 %v1540_v39  ;;  %v484_v54 = vld [vmem:[#allocation5 + $0x48] sm:$0xff]  ;;  %v515_v55 = vld [vmem:[#allocation5 + $0x140] sm:$0xff]  ;;  %v1576_v56 = vpack.c.bf16 %v532_v50, %v531_v49  ;;  %v502_v59 = vld [vmem:[#allocation5 + $0xd8] sm:$0xff] }
  0x98   : > { %1571 = vmatpush3.bf16.msra.mxu1 %v1570_v38  ;;  %v516_v57 = vld [vmem:[#allocation5 + $0x148] sm:$0xff]  ;;  %v533_v60 = vld [vmem:[#allocation5 + $0x1d0] sm:$0xff]  ;;  %v534_v61 = vld [vmem:[#allocation5 + $0x1d8] sm:$0xff]  ;;  %v1546_v62 = vpack.c.bf16 %v484_v54, %v483_v53  ;;  %v1548_v0 = vpack.c.bf16 %v502_v59, %v501_v58 }
  0x99   : > { %1573 = vmatprep.subr.bf16.mxu1 %v1572_v43  ;;  %v1578_v63 = vpack.c.bf16 %v516_v57, %v515_v55  ;;  %v485_v1 = vld [vmem:[#allocation5 + $0x50] sm:$0xff]  ;;  %v486_v2 = vld [vmem:[#allocation5 + $0x58] sm:$0xff]  ;;  %v1580_v4 = vpack.c.bf16 %v534_v61, %v533_v60  ;;  %v503_v6 = vld [vmem:[#allocation5 + $0xe0] sm:$0xff] }
  0x9a   : > { %1543 = vmatpush3.bf16.msra.mxu0 %v1542_v48  ;;  %v517_v3 = vld [vmem:[#allocation5 + $0x150] sm:$0xff]  ;;  %v518_v5 = vld [vmem:[#allocation5 + $0x158] sm:$0xff]  ;;  %v504_v7 = vld [vmem:[#allocation5 + $0xe8] sm:$0xff]  ;;  %v1550_v10 = vpack.c.bf16 %v486_v2, %v485_v1 }
  0x9b   : > { %1545 = vmatprep.subr.bf16.mxu0 %v1544_v52  ;;  %v535_v8 = vld [vmem:[#allocation5 + $0x1e0] sm:$0xff]  ;;  %v536_v9 = vld [vmem:[#allocation5 + $0x1e8] sm:$0xff]  ;;  %v1582_v13 = vpack.c.bf16 %v518_v5, %v517_v3  ;;  %v1552_v14 = vpack.c.bf16 %v504_v7, %v503_v6  ;;  %v505_v19 = vld [vmem:[#allocation5 + $0xf0] sm:$0xff] }
  0x9c   : > { %1575 = vmatpush3.bf16.msra.mxu1 %v1574_v51  ;;  %v487_v11 = vld [vmem:[#allocation5 + $0x60] sm:$0xff]  ;;  %v488_v12 = vld [vmem:[#allocation5 + $0x68] sm:$0xff]  ;;  %v1584_v18 = vpack.c.bf16 %v536_v9, %v535_v8  ;;  %v506_v20 = vld [vmem:[#allocation5 + $0xf8] sm:$0xff] }
  0x9d   : > { %1577 = vmatprep.subr.bf16.mxu1 %v1576_v56  ;;  %v519_v15 = vld [vmem:[#allocation5 + $0x160] sm:$0xff]  ;;  %v520_v16 = vld [vmem:[#allocation5 + $0x168] sm:$0xff]  ;;  %v470_v21 = vld [vmem:[%s2203_s28 + $0x18] sm:$0xff]  ;;  %v1554_v24 = vpack.c.bf16 %v488_v12, %v487_v11  ;;  %v1556_v26 = vpack.c.bf16 %v506_v20, %v505_v19 }
  0x9e   : > { %1547 = vmatpush3.bf16.msra.mxu0 %v1546_v62  ;;  %v468_v17 = vld [vmem:[%s2203_s28 + $0x8] sm:$0xff]  ;;  %v537_v22 = vld [vmem:[#allocation5 + $0x1f0] sm:$0xff]  ;;  %v538_v23 = vld [vmem:[#allocation5 + $0x1f8] sm:$0xff]  ;;  %744 = vmatprep.mubr.f32.mxu1 %v470_v21  ;;  %v1586_v25 = vpack.c.bf16 %v520_v16, %v519_v15 }
  0x9f   : > { %1549 = vmatprep.subr.bf16.mxu0 %v1548_v0  ;;  %674 = vmatprep.mubr.f32.mxu0 %v468_v17  ;;  %v489_v27 = vld [vmem:[#allocation5 + $0x70] sm:$0xff]  ;;  %v490_v28 = vld [vmem:[#allocation5 + $0x78] sm:$0xff]  ;;  %v1588_v30 = vpack.c.bf16 %v538_v23, %v537_v22  ;;  %v555_v32 = vld [vmem:[#allocation5 + $0x280] sm:$0xff] }
  0xa0   : > { %1579 = vmatpush3.bf16.msra.mxu1 %v1578_v63  ;;  %v521_v29 = vld [vmem:[#allocation5 + $0x170] sm:$0xff]  ;;  %v522_v31 = vld [vmem:[#allocation5 + $0x178] sm:$0xff]  ;;  %v556_v33 = vld [vmem:[#allocation5 + $0x288] sm:$0xff]  ;;  %v1558_v36 = vpack.c.bf16 %v490_v28, %v489_v27 }
  0xa1   : > { %1581 = vmatprep.subr.bf16.mxu1 %v1580_v4  ;;  %v587_v34 = vld [vmem:[#allocation5 + $0x380] sm:$0xff]  ;;  %v588_v35 = vld [vmem:[#allocation5 + $0x388] sm:$0xff]  ;;  %v1590_v37 = vpack.c.bf16 %v522_v31, %v521_v29  ;;  %v1592_v38 = vpack.c.bf16 %v556_v33, %v555_v32  ;;  %v557_v44 = vld [vmem:[#allocation5 + $0x290] sm:$0xff] }
  0xa2   : > { %1551 = vmatpush3.bf16.msra.mxu0 %v1550_v10  ;;  %v539_v39 = vld [vmem:[#allocation5 + $0x200] sm:$0xff]  ;;  %v540_v40 = vld [vmem:[#allocation5 + $0x208] sm:$0xff]  ;;  %v1624_v42 = vpack.c.bf16 %v588_v35, %v587_v34  ;;  %v558_v45 = vld [vmem:[#allocation5 + $0x298] sm:$0xff] }
  0xa3   : > { %1553 = vmatprep.subr.bf16.mxu0 %v1552_v14  ;;  %v571_v41 = vld [vmem:[#allocation5 + $0x300] sm:$0xff]  ;;  %v572_v43 = vld [vmem:[#allocation5 + $0x308] sm:$0xff]  ;;  %v589_v46 = vld [vmem:[#allocation5 + $0x390] sm:$0xff]  ;;  %v1594_v49 = vpack.c.bf16 %v540_v40, %v539_v39  ;;  %v1596_v52 = vpack.c.bf16 %v558_v45, %v557_v44 }
  0xa4   : > { %1583 = vmatpush3.bf16.msra.mxu1 %v1582_v13  ;;  %v590_v47 = vld [vmem:[#allocation5 + $0x398] sm:$0xff]  ;;  %v467_v48 = vld [vmem:[%s2203_s28] sm:$0xff]  ;;  %v469_v50 = vld [vmem:[%s2203_s28 + $0x10] sm:$0xff]  ;;  %v1626_v51 = vpack.c.bf16 %v572_v43, %v571_v41 }
  0xa5   : > { %1585 = vmatprep.subr.bf16.mxu1 %v1584_v18  ;;  %v541_v53 = vld [vmem:[#allocation5 + $0x210] sm:$0xff]  ;;  %v542_v54 = vld [vmem:[#allocation5 + $0x218] sm:$0xff]  ;;  %v1628_v56 = vpack.c.bf16 %v590_v47, %v589_v46  ;;  %v559_v58 = vld [vmem:[#allocation5 + $0x2a0] sm:$0xff] }
  0xa6   : > { %1555 = vmatpush3.bf16.msra.mxu0 %v1554_v24  ;;  %v573_v55 = vld [vmem:[#allocation5 + $0x310] sm:$0xff]  ;;  %v574_v57 = vld [vmem:[#allocation5 + $0x318] sm:$0xff]  ;;  %v560_v59 = vld [vmem:[#allocation5 + $0x2a8] sm:$0xff]  ;;  %v1598_v62 = vpack.c.bf16 %v542_v54, %v541_v53 }
  0xa7   : > { %1557 = vmatprep.subr.bf16.mxu0 %v1556_v26  ;;  %v591_v60 = vld [vmem:[#allocation5 + $0x3a0] sm:$0xff]  ;;  %v592_v61 = vld [vmem:[#allocation5 + $0x3a8] sm:$0xff]  ;;  %v1630_v63 = vpack.c.bf16 %v574_v57, %v573_v55  ;;  %v1600_v0 = vpack.c.bf16 %v560_v59, %v559_v58  ;;  %v561_v6 = vld [vmem:[#allocation5 + $0x2b0] sm:$0xff] }
  0xa8   : > { %1587 = vmatpush3.bf16.msra.mxu1 %v1586_v25  ;;  %v543_v1 = vld [vmem:[#allocation5 + $0x220] sm:$0xff]  ;;  %v544_v2 = vld [vmem:[#allocation5 + $0x228] sm:$0xff]  ;;  %v1632_v4 = vpack.c.bf16 %v592_v61, %v591_v60  ;;  %v562_v7 = vld [vmem:[#allocation5 + $0x2b8] sm:$0xff] }
  0xa9   : > { %1589 = vmatprep.subr.bf16.mxu1 %v1588_v30  ;;  %v575_v3 = vld [vmem:[#allocation5 + $0x320] sm:$0xff]  ;;  %v576_v5 = vld [vmem:[#allocation5 + $0x328] sm:$0xff]  ;;  %v593_v8 = vld [vmem:[#allocation5 + $0x3b0] sm:$0xff]  ;;  %v1602_v10 = vpack.c.bf16 %v544_v2, %v543_v1  ;;  %v1604_v12 = vpack.c.bf16 %v562_v7, %v561_v6 }
  0xaa   : > { %1559 = vmatpush3.bf16.msra.mxu0 %v1558_v36  ;;  %v594_v9 = vld [vmem:[#allocation5 + $0x3b8] sm:$0xff]  ;;  %v1634_v11 = vpack.c.bf16 %v576_v5, %v575_v3  ;;  %v545_v13 = vld [vmem:[#allocation5 + $0x230] sm:$0xff]  ;;  %v563_v18 = vld [vmem:[#allocation5 + $0x2c0] sm:$0xff] }
  0xab   : > { %1593 = vmatprep.subr.bf16.mxu0 %v1592_v38  ;;  %v546_v14 = vld [vmem:[#allocation5 + $0x238] sm:$0xff]  ;;  %v577_v15 = vld [vmem:[#allocation5 + $0x330] sm:$0xff]  ;;  %v1636_v16 = vpack.c.bf16 %v594_v9, %v593_v8  ;;  %v564_v19 = vld [vmem:[#allocation5 + $0x2c8] sm:$0xff] }
  0xac   : > { %1591 = vmatpush3.bf16.msra.mxu1 %v1590_v37  ;;  %v578_v17 = vld [vmem:[#allocation5 + $0x338] sm:$0xff]  ;;  %v595_v20 = vld [vmem:[#allocation5 + $0x3c0] sm:$0xff]  ;;  %v596_v21 = vld [vmem:[#allocation5 + $0x3c8] sm:$0xff]  ;;  %v1606_v22 = vpack.c.bf16 %v546_v14, %v545_v13  ;;  %v1608_v26 = vpack.c.bf16 %v564_v19, %v563_v18 }
  0xad   : > { %1625 = vmatprep.subr.bf16.mxu1 %v1624_v42  ;;  %675 = vmatmul.mubr.f32.vlgmr.msra.gmra.mrb[0].mxu0 %v467_v48  ;;  %v472_v23 = vld [vmem:[%s2203_s28 + $0x28] sm:$0xff]  ;;  %v474_v24 = vld [vmem:[%s2203_s28 + $0x38] sm:$0xff]  ;;  %v1638_v25 = vpack.c.bf16 %v578_v17, %v577_v15  ;;  %v547_v27 = vld [vmem:[#allocation5 + $0x240] sm:$0xff]  ;;  %v1640_v30 = vpack.c.bf16 %v596_v21, %v595_v20 }
  0xae   : > { %1595 = vmatpush3.bf16.msra.mxu0 %v1594_v49  ;;  %v548_v28 = vld [vmem:[#allocation5 + $0x248] sm:$0xff]  ;;  %v579_v29 = vld [vmem:[#allocation5 + $0x340] sm:$0xff]  ;;  %v565_v32 = vld [vmem:[#allocation5 + $0x2d0] sm:$0xff]  ;;  %814 = vmatprep.mubr.f32.mxu0 %v472_v23 }
  0xaf   : > { %745 = vmatmul.mubr.f32.vlgmr.msra.gmra.mrb[0].mxu1 %v469_v50  ;;  %1597 = vmatprep.subr.bf16.mxu0 %v1596_v52  ;;  %v580_v31 = vld [vmem:[#allocation5 + $0x348] sm:$0xff]  ;;  %v566_v33 = vld [vmem:[#allocation5 + $0x2d8] sm:$0xff]  ;;  %v597_v34 = vld [vmem:[#allocation5 + $0x3d0] sm:$0xff]  ;;  %v1610_v36 = vpack.c.bf16 %v548_v28, %v547_v27 }
  0xb0   : > { %1627 = vmatpush3.bf16.msra.mxu1 %v1626_v51  ;;  %v598_v35 = vld [vmem:[#allocation5 + $0x3d8] sm:$0xff]  ;;  %884 = vmatprep.mubr.f32.mxu1 %v474_v24  ;;  %v1642_v37 = vpack.c.bf16 %v580_v31, %v579_v29  ;;  %v1612_v38 = vpack.c.bf16 %v566_v33, %v565_v32  ;;  %v549_v39 = vld [vmem:[#allocation5 + $0x250] sm:$0xff]  ;;  %v567_v44 = vld [vmem:[#allocation5 + $0x2e0] sm:$0xff] }
  0xb1   : > { %1629 = vmatprep.subr.bf16.mxu1 %v1628_v56  ;;  %v550_v40 = vld [vmem:[#allocation5 + $0x258] sm:$0xff]  ;;  %v581_v41 = vld [vmem:[#allocation5 + $0x350] sm:$0xff]  ;;  %v1644_v42 = vpack.c.bf16 %v598_v35, %v597_v34  ;;  %v568_v45 = vld [vmem:[#allocation5 + $0x2e8] sm:$0xff] }
  0xb2   : > { %1599 = vmatpush3.bf16.msra.mxu0 %v1598_v62  ;;  %v582_v43 = vld [vmem:[#allocation5 + $0x358] sm:$0xff]  ;;  %v599_v46 = vld [vmem:[#allocation5 + $0x3e0] sm:$0xff]  ;;  %v600_v47 = vld [vmem:[#allocation5 + $0x3e8] sm:$0xff]  ;;  %v1614_v48 = vpack.c.bf16 %v550_v40, %v549_v39  ;;  %v1616_v50 = vpack.c.bf16 %v568_v45, %v567_v44 }
  0xb3   : > { %1601 = vmatprep.subr.bf16.mxu0 %v1600_v0  ;;  %v1646_v49 = vpack.c.bf16 %v582_v43, %v581_v41  ;;  %v551_v51 = vld [vmem:[#allocation5 + $0x260] sm:$0xff]  ;;  %v552_v52 = vld [vmem:[#allocation5 + $0x268] sm:$0xff]  ;;  %v1648_v54 = vpack.c.bf16 %v600_v47, %v599_v46  ;;  %v569_v56 = vld [vmem:[#allocation5 + $0x2f0] sm:$0xff] }
  0xb4   : > { %1631 = vmatpush3.bf16.msra.mxu1 %v1630_v63  ;;  %v583_v53 = vld [vmem:[#allocation5 + $0x360] sm:$0xff]  ;;  %v584_v55 = vld [vmem:[#allocation5 + $0x368] sm:$0xff]  ;;  %v570_v57 = vld [vmem:[#allocation5 + $0x2f8] sm:$0xff]  ;;  %v1618_v60 = vpack.c.bf16 %v552_v52, %v551_v51 }
  0xb5   : > { %1633 = vmatprep.subr.bf16.mxu1 %v1632_v4  ;;  %v601_v58 = vld [vmem:[#allocation5 + $0x3f0] sm:$0xff]  ;;  %v602_v59 = vld [vmem:[#allocation5 + $0x3f8] sm:$0xff]  ;;  %v1650_v61 = vpack.c.bf16 %v584_v55, %v583_v53  ;;  %v1620_v62 = vpack.c.bf16 %v570_v57, %v569_v56  ;;  %v471_v6 = vld [vmem:[%s2203_s28 + $0x20] sm:$0xff] }
  0xb6   : > { %1603 = vmatpush3.bf16.msra.mxu0 %v1602_v10  ;;  %v553_v63 = vld [vmem:[#allocation5 + $0x270] sm:$0xff]  ;;  %v554_v0 = vld [vmem:[#allocation5 + $0x278] sm:$0xff]  ;;  %v1652_v1 = vpack.c.bf16 %v602_v59, %v601_v58  ;;  %v892_v8 = vld [vmem:[#allocation7 + $0x8] sm:$0xff] }
  0xb7   : > { %1605 = vmatprep.subr.bf16.mxu0 %v1604_v12  ;;  %v585_v2 = vld [vmem:[#allocation5 + $0x370] sm:$0xff]  ;;  %v586_v3 = vld [vmem:[#allocation5 + $0x378] sm:$0xff]  ;;  %v1622_v4 = vpack.c.bf16 %v554_v0, %v553_v63  ;;  %v891_v10 = vld [vmem:[#allocation7] sm:$0xff]  ;;  %v1967_v12 = vmov 0.0|0.0  }
  0xb8   : > { %1635 = vmatpush3.bf16.msra.mxu1 %v1634_v11  ;;  %v1654_v5 = vpack.c.bf16 %v586_v3, %v585_v2  ;;  %v473_v7 = vld [vmem:[%s2203_s28 + $0x30] sm:$0xff]  ;;  %v894_v9 = vld [vmem:[#allocation7 + $0x18] sm:$0xff]  ;;  %v1034_v14 = vld [vmem:[#allocation8] sm:$0xff]  ;;  %s2310_s28 = sld [smem:[#allocation15_spill]] }
  0xb9   : > { %1637 = vmatprep.subr.bf16.mxu1 %v1636_v16  ;;  %v1656_v11 = vpack.c.bf16 %v894_v9, %v892_v8  ;;  %v893_v13 = vld [vmem:[#allocation7 + $0x10] sm:$0xff]  ;;  %v1035_v15 = vld [vmem:[#allocation8 + $0x8] sm:$0xff]  ;;  %v898_v19 = vld [vmem:[#allocation7 + $0x38] sm:$0xff] }
  0xba   : > { %1607 = vmatpush3.bf16.msra.mxu0 %v1606_v22  ;;  %v1658_v16 = vpack.c.bf16 %v893_v13, %v891_v10  ;;  %v1689_v17 = vpack.c.bf16 %v1035_v15, %v1034_v14  ;;  %v896_v18 = vld [vmem:[#allocation7 + $0x28] sm:$0xff]  ;;  %v895_v20 = vld [vmem:[#allocation7 + $0x20] sm:$0xff]  ;;  %v897_v22 = vld [vmem:[#allocation7 + $0x30] sm:$0xff] }
  0xbb   : > { %1609 = vmatprep.subr.bf16.mxu0 %v1608_v26  ;;  %v1660_v21 = vpack.c.bf16 %v898_v19, %v896_v18  ;;  %v1036_v23 = vld [vmem:[#allocation8 + $0x10] sm:$0xff]  ;;  %v1037_v24 = vld [vmem:[#allocation8 + $0x18] sm:$0xff]  ;;  %v900_v27 = vld [vmem:[#allocation7 + $0x48] sm:$0xff]  ;;  %v1968_v18 = vmov 0.0  }
  0xbc   : > { %1639 = vmatpush3.bf16.msra.mxu1 %v1638_v25  ;;  %v1662_v25 = vpack.c.bf16 %v897_v22, %v895_v20  ;;  %v1692_v26 = vpack.c.bf16 %v1037_v24, %v1036_v23  ;;  %v902_v28 = vld [vmem:[#allocation7 + $0x58] sm:$0xff]  ;;  %v899_v29 = vld [vmem:[#allocation7 + $0x40] sm:$0xff]  ;;  %v901_v31 = vld [vmem:[#allocation7 + $0x50] sm:$0xff] }
  0xbd   : > { %1641 = vmatprep.subr.bf16.mxu1 %v1640_v30  ;;  %v1664_v30 = vpack.c.bf16 %v902_v28, %v900_v27  ;;  %v1038_v32 = vld [vmem:[#allocation8 + $0x20] sm:$0xff]  ;;  %v1039_v33 = vld [vmem:[#allocation8 + $0x28] sm:$0xff]  ;;  %v906_v35 = vld [vmem:[#allocation7 + $0x78] sm:$0xff] }
  0xbe   : > { %1611 = vmatpush3.bf16.msra.mxu0 %v1610_v36  ;;  %v904_v34 = vld [vmem:[#allocation7 + $0x68] sm:$0xff]  ;;  %v1666_v36 = vpack.c.bf16 %v901_v31, %v899_v29  ;;  %v905_v40 = vld [vmem:[#allocation7 + $0x70] sm:$0xff]  ;;  %v910_v44 = vld [vmem:[#allocation7 + $0x98] sm:$0xff]  ;;  %s466_s23 = scalar_lea.vmem %s2310_s28, %s1326_s12 }
  0xbf   : > { %1613 = vmatprep.subr.bf16.mxu0 %v1612_v38  ;;  %v903_v38 = vld [vmem:[#allocation7 + $0x60] sm:$0xff]  ;;  %v1668_v39 = vpack.c.bf16 %v906_v35, %v904_v34  ;;  %v1040_v41 = vld [vmem:[#allocation8 + $0x30] sm:$0xff]  ;;  %v908_v43 = vld [vmem:[#allocation7 + $0x88] sm:$0xff] }
  0xc0   : > { %1643 = vmatpush3.bf16.msra.mxu1 %v1642_v37  ;;  %v1695_v37 = vpack.c.bf16 %v1039_v33, %v1038_v32  ;;  %v1670_v45 = vpack.c.bf16 %v905_v40, %v903_v38  ;;  %v907_v47 = vld [vmem:[#allocation7 + $0x80] sm:$0xff]  ;;  %v1043_v51 = vld [vmem:[#allocation8 + $0x48] sm:$0xff]  ;;  %v914_v53 = vld [vmem:[#allocation7 + $0xb8] sm:$0xff] }
  0xc1   : > { %1645 = vmatprep.subr.bf16.mxu1 %v1644_v42  ;;  %v1041_v42 = vld [vmem:[#allocation8 + $0x38] sm:$0xff]  ;;  %v912_v52 = vld [vmem:[#allocation7 + $0xa8] sm:$0xff]  ;;  %v911_v56 = vld [vmem:[#allocation7 + $0xa0] sm:$0xff] }
  0xc2   : > { %1615 = vmatpush3.bf16.msra.mxu0 %v1614_v48  ;;  %v1698_v46 = vpack.c.bf16 %v1041_v42, %v1040_v41  ;;  %v1672_v48 = vpack.c.bf16 %v910_v44, %v908_v43  ;;  %v1676_v57 = vpack.c.bf16 %v914_v53, %v912_v52  ;;  %v913_v58 = vld [vmem:[#allocation7 + $0xb0] sm:$0xff]  ;;  %v916_v63 = vld [vmem:[#allocation7 + $0xc8] sm:$0xff]  ;;  %v918_v0 = vld [vmem:[#allocation7 + $0xd8] sm:$0xff] }
  0xc3   : > { %1617 = vmatprep.subr.bf16.mxu0 %v1616_v50  ;;  %v1042_v50 = vld [vmem:[#allocation8 + $0x40] sm:$0xff]  ;;  %v1044_v59 = vld [vmem:[#allocation8 + $0x50] sm:$0xff]  ;;  %v920_v8 = vld [vmem:[#allocation7 + $0xe8] sm:$0xff] }
  0xc4   : > { %1647 = vmatpush3.bf16.msra.mxu1 %v1646_v49  ;;  %v909_v49 = vld [vmem:[#allocation7 + $0x90] sm:$0xff]  ;;  %v1701_v55 = vpack.c.bf16 %v1043_v51, %v1042_v50  ;;  %v915_v2 = vld [vmem:[#allocation7 + $0xc0] sm:$0xff]  ;;  %v922_v9 = vld [vmem:[#allocation7 + $0xf8] sm:$0xff] }
  0xc5   : > { %1649 = vmatprep.subr.bf16.mxu1 %v1648_v54  ;;  %v1674_v54 = vpack.c.bf16 %v909_v49, %v907_v47  ;;  %v917_v3 = vld [vmem:[#allocation7 + $0xd0] sm:$0xff]  ;;  %v1684_v10 = vpack.c.bf16 %v922_v9, %v920_v8  ;;  %v1328_v20 = vld [vmem:[%s2278_s2] ss:$0 sm:$0xff] }
  0xc6   : > { %1619 = vmatpush3.bf16.msra.mxu0 %v1618_v60  ;;  %v1045_v60 = vld [vmem:[#allocation8 + $0x58] sm:$0xff]  ;;  %v921_v13 = vld [vmem:[#allocation7 + $0xf0] sm:$0xff]  ;;  %v1008_v43 = vld [vmem:[%s2281_s5] sm:$0x3] }
  0xc7   : > { %1621 = vmatprep.subr.bf16.mxu0 %v1620_v62  ;;  %v1704_v62 = vpack.c.bf16 %v1045_v60, %v1044_v59  ;;  %v1048_v14 = vld [vmem:[#allocation8 + $0x70] sm:$0xff]  ;;  %v1026_v60 = vstv %s1025_s16 }
  0xc8   : > { %1651 = vmatpush3.bf16.msra.mxu1 %v1650_v61  ;;  %v1678_v61 = vpack.c.bf16 %v913_v58, %v911_v56 }
  0xc9   : > { %1653 = vmatprep.subr.bf16.mxu1 %v1652_v1  ;;  %v1680_v1 = vpack.c.bf16 %v918_v0, %v916_v63 }
  0xca   : > { %1623 = vmatpush3.bf16.msra.mxu0 %v1622_v4  ;;  %v1046_v4 = vld [vmem:[#allocation8 + $0x60] sm:$0xff] }
  0xcb   : > { %1657 = vmatprep.subr.bf16.mxu0 %v1656_v11  ;;  %v919_v11 = vld [vmem:[#allocation7 + $0xe0] sm:$0xff] }
  0xcc   : > { %1655 = vmatpush3.bf16.msra.mxu1 %v1654_v5  ;;  %v1682_v5 = vpack.c.bf16 %v917_v3, %v915_v2  ;;  %v1686_v15 = vpack.c.bf16 %v921_v13, %v919_v11 }
  0xcd   : > { %815 = vmatmul.mubr.f32.vlgmr.msra.gmra.mrb[2].mxu0 %v471_v6  ;;  %1688 = vmatprep.subr.bf16.mxu1 %v1967_v12  ;;  %v1047_v6 = vld [vmem:[#allocation8 + $0x68] sm:$0xff] }
  0xce   : > { %1659 = vmatpush1.bf16.msra.mxu0 %v1658_v16  ;;  %v1049_v16 = vld [vmem:[#allocation8 + $0x78] sm:$0xff]  ;;  %999 = vmatprep.mubr.f32.mxu0 %v1968_v18 }
  0xcf   : > { %885 = vmatmul.mubr.f32.vlgmr.msra.gmra.mrb[2].mxu1 %v473_v7  ;;  %1661 = vmatprep.subr.bf16.mxu0 %v1660_v21  ;;  %v1707_v7 = vpack.c.bf16 %v1047_v6, %v1046_v4  ;;  %v1137_v4 = vld [vmem:[%s2284_s8] sm:$0x1] }
  0xd0   : > { %1690 = vmatpush3.bf16.msra.mxu1 %v1689_v17  ;;  %v1710_v17 = vpack.c.bf16 %v1049_v16, %v1048_v14  ;;  %1525 = vmatprep.mubr.msk.f32.mxu1 %vm1969_vm0, %v1968_v18 }
  0xd1   : > { %1691 = vmatprep.subr.bf16.mxu1 %v1967_v12 }
  0xd2   : > { %1663 = vmatpush1.bf16.msra.mxu0 %v1662_v25 }
  0xd3   : > { %1665 = vmatprep.subr.bf16.mxu0 %v1664_v30 }
  0xd4   : > { %1693 = vmatpush3.bf16.msra.mxu1 %v1692_v26 }
  0xd5   : > { %1694 = vmatprep.subr.bf16.mxu1 %v1967_v12 }
  0xd6   : > { %1667 = vmatpush1.bf16.msra.mxu0 %v1666_v36  ;;  %v925_v36 = vlaneseq }
  0xd7   : > { %1669 = vmatprep.subr.bf16.mxu0 %v1668_v39  ;;  %v923_v39 = vld [vmem:[%s2280_s4] sm:$0x3] }
  0xd8   : > { %1696 = vmatpush3.bf16.msra.mxu1 %v1695_v37  ;;  %v926_v37 = vshrl.u32 %v925_v36, 7 }
  0xd9   : > { %1697 = vmatprep.subr.bf16.mxu1 %v1967_v12 }
  0xda   : > { %1671 = vmatpush1.bf16.msra.mxu0 %v1670_v45  ;;  %v927_v38 = vsub.s32 0, %v926_v37  ;;  %v931_v40 = vsub.s32 1, %v926_v37 }
  0xdb   : > { %1673 = vmatprep.subr.bf16.mxu0 %v1672_v48 }
  0xdc   : > { %1699 = vmatpush3.bf16.msra.mxu1 %v1698_v46  ;;  %v928_v41 = vrot.slane %v923_v39, %v927_v38  ;;  %v932_v42 = vrot.slane %v923_v39, %v931_v40  ;;  %v1013_v49 = vrot.slane %v1008_v43, %v927_v38  ;;  %v1017_v51 = vrot.slane %v1008_v43, %v931_v40 }
  0xdd   : > { %1700 = vmatprep.subr.bf16.mxu1 %v1967_v12 }
  0xde   : > { %1675 = vmatpush1.bf16.msra.mxu0 %v1674_v54 }
  0xdf   : > { %1677 = vmatprep.subr.bf16.mxu0 %v1676_v57  ;;  %v1330_v57 = vld [vmem:[%s2284_s8] ss:$0 sm:$0xff] }
  0xe0   : > { %1702 = vmatpush3.bf16.msra.mxu1 %v1701_v55 }
  0xe1   : > { %1703 = vmatprep.subr.bf16.mxu1 %v1967_v12 }
  0xe2   : > { %1679 = vmatpush1.bf16.msra.mxu0 %v1678_v61 }
  0xe3   : > { %1681 = vmatprep.subr.bf16.mxu0 %v1680_v1 }
  0xe4   : > { %1705 = vmatpush3.bf16.msra.mxu1 %v1704_v62 }
  0xe5   : > { %1706 = vmatprep.subr.bf16.mxu1 %v1967_v12 }
  0xe6   : > { %1683 = vmatpush1.bf16.msra.mxu0 %v1682_v5  ;;  %v1142_v5 = vrot.slane %v1137_v4, %v927_v38 }
  0xe7   : > { %1685 = vmatprep.subr.bf16.mxu0 %v1684_v10 }
  0xe8   : > { %1708 = vmatpush3.bf16.msra.mxu1 %v1707_v7 }
  0xe9   : > { %1709 = vmatprep.subr.bf16.mxu1 %v1967_v12 }
  0xea   : > { %1687 = vmatpush1.bf16.msra.mxu0 %v1686_v15 }
  0xec   : > { %1711 = vmatpush3.bf16.msra.mxu1 %v1710_v17 }
 0x180   : > { %v1368_v19 = vpop.f32.mrb[0].mxu0 }
 0x181   : > { %v1369_v21 = vpop.f32.mrb[1].mxu0 }
 0x182   : > { %v1403_v22 = vpop.f32.mrb[0].mxu1  ;;  %v1370_v23 = vadd.f32 %v1369_v21, %v1368_v19 }
 0x183   : > { %v1404_v24 = vpop.f32.mrb[1].mxu1 }
 0x184   : > { %v1405_v12 = vadd.f32 %v1404_v24, %v1403_v22  ;;  %v677_v25 = vadd.f32 %v1370_v23, %v1328_v20 }
 0x186   : > { %v747_v26 = vadd.f32 %v1405_v12, %v677_v25 }
 0x1a0   : > { %v1438_v27 = vpop.f32.mrb[2].mxu0 }
 0x1a1   : > { %v1439_v28 = vpop.f32.mrb[3].mxu0 }
 0x1a2   : > { %v1473_v29 = vpop.f32.mrb[2].mxu1  ;;  %v1440_v30 = vadd.f32 %v1439_v28, %v1438_v27 }
 0x1a3   : > { %v1474_v31 = vpop.f32.mrb[3].mxu1 }
 0x1a4   : > { %v1475_v32 = vadd.f32 %v1474_v31, %v1473_v29  ;;  %v817_v33 = vadd.f32 %v1440_v30, %v747_v26 }
 0x1a6   : > { %v887_v34 = vadd.f32 %v1475_v32, %v817_v33 }
 0x1a8   : > { %v890_v35 = vmax.f32 %v887_v34, 0.0 }
 0x1aa   : > { %1000 = vmatmul.mubr.f32.vlgmr.msra.gmra.mrb[4].mxu0 %v890_v35  ;;  %1526 = vmatmul.mubr.f32.vlgmr.msra.gmra.mrb[4].mxu1 %v890_v35 }
 0x27d   : > { %v1001_v44 = vpop.f32.mrb[4].mxu0  ;;  %v1123_v45 = vpop.f32.mrb[4].mxu1 }
 0x27e   : > { %v1002_v46 = vadd.f32 %v1001_v44, %v928_v41  ;;  %v1003_v47 = vpop.f32.mrb[5].mxu0  ;;  %v1527_v48 = vpop.f32.mrb[5].mxu1  ;;  %v1124_v58 = vadd.f32 %v1330_v57, %v1123_v45 }
 0x27f   : > { %v1004_v50 = vadd.f32 %v1003_v47, %v932_v42 }
 0x280   : > { %v1006_v52 = vmax.f32 %v1002_v46, 0.0  ;;  %v1331_v59 = vmul.f32 -1.442695, %v1124_v58  ;;  %v1144_v7 = vsub.f32 %v1124_v58, %v1142_v5 }
 0x281   : > { %v1007_v53 = vmax.f32 %v1004_v50, 0.0 }
 0x282   : > { %v1020_v54 = vmul.f32 %v1013_v49, %v1006_v52  ;;  %1789 = vpow2.f32 %v1331_v59 }
 0x283   : > { %v1021_v55 = vmul.f32 %v1017_v51, %v1007_v53 }
 0x285   : > { %v1022_v56 = vadd.f32 %v1021_v55, %v1020_v54 }
 0x287   : > { %1023 = vadd.xlane.f32.xlu0 %v1022_v56 }
 0x28c   : > { %v1790_v0 = vpop.eup %1789 }
 0x28d   : > { %v1130_v1 = vadd.f32 1.0, %v1790_v0 }
 0x314   : > { %v1024_v61 = vpop.xlane.xlu0 %1023 }
 0x315   : > { %v1027_v62 = vadd.f32 %v1026_v60, %v1024_v61 }
 0x317   : > { %v1329_v63 = vmul.f32 -1.442695, %v1027_v62 }
 0x319   : > { %1791 = vpow2.f32 %v1329_v63 }
 0x31a   : > { %1793 = vrcp.f32 %v1130_v1 }
 0x323   : > { %v1792_v2 = vpop.eup %1791 }
 0x324   : > { %v1031_v3 = vadd.f32 1.0, %v1792_v2  ;;  %v1794_v6 = vpop.eup %1793 }
 0x326   : > { %1795 = vrcp.f32 %v1031_v3 }
 0x330   : > { %v1796_v8 = vpop.eup %1795 }
 0x331   : > { %v1133_v9 = vmul.f32 %v1796_v8, %v1794_v6  ;;  %1136 = vst.msk [vmem:[%s462_s18] sm:$0xff] %vm1134_vm1, %v1796_v8  ;;  %v1145_v10 = vmul.f32 %v1796_v8, %v1144_v7 }
 0x333   : > { %1135 = vst.msk [vmem:[%s466_s23] sm:$0xff] %vm1134_vm1, %v1133_v9  ;;  %v1146_v11 = vsel %vm1134_vm1, %v1145_v10, 0.0 }
 0x334   : > { %v1147_v13 = vrot.slane %v1146_v11, 4 }
 0x336   : > { %v1148_v14 = vadd.f32 %v1147_v13, %v1146_v11 }
 0x338   : > { %v1149_v15 = vrot.slane %v1148_v14, 2 }
 0x33a   : > { %v1150_v16 = vadd.f32 %v1149_v15, %v1148_v14 }
 0x33c   : > { %v1151_v17 = vrot.slane %v1150_v16, 1 }
 0x33e   : > { %v1152_v18 = vadd.f32 %v1151_v17, %v1150_v16 }
 0x340   : > { %v1153_v19 = vadd.f32 %v1152_v18, %v1137_v4 }
 0x342   : > { %v1332_v20 = vmul.f32 -1.442695, %v1153_v19 }
 0x344   : > { %1797 = vpow2.f32 %v1332_v20 }
 0x34e   : > { %v1798_v21 = vpop.eup %1797 }
 0x34f   : > { %v1157_v22 = vadd.f32 1.0, %v1798_v21 }
 0x351   : > { %1799 = vrcp.f32 %v1157_v22 }
 0x35b   : > { %v1800_v23 = vpop.eup %1799 }
 0x35c   : > { %1161 = vst.msk [vmem:[%s458_s29] sm:$0x1] %vm1160_vm2, %v1800_v23 }
 0x35d PF: > { %p25_p4 = scmp.ge.s32.totalorder %s2129_s17, 4   ;;  %s2312_s19 = smov %s1949_s20 }
 0x35e   : > { %s2313_s20 = smov %s1953_s21  ;;  %s2314_s21 = smov %s2160_s27 }
 0x35f   : > { %s2315_s22 = smov %s2129_s17  ;;  %27 = sbr.rel (!%p25_p4) target bundleno = 10 (0xa), region = 132 }
 0x366   :  { %1207 = vsyncpa [#allocation4], 1 }
 0x367   :  { %1209 = vsyncpa [#allocation4 + $0x1], 1 }
 0x368   :  { %1210 = vsyncpa [#allocation6], 1 }
 0x369   :  { %1211 = vsyncpa [#allocation9], 1 }

</bundles_post_ra>
